<compile_context>
chip_gen: v7x
topology: tpu7x:2x2x1
jax: 0.10.0
libtpu: 0.0.40
codegen_flags: <defaults>
</compile_context>

<pallas_src>
import jax
import jax.numpy as jnp
from jax.experimental import pallas as pl
from jax.experimental.pallas import tpu as pltpu


def _round_up(x, m):
    return ((x + m - 1) // m) * m


def _linreg_kernel(x_ref, w_ref, b_ref, o_ref):
    """One batch tile: o = sum(x * w, axis=-1) + b.

    x_ref: (TM, F) f32 VMEM tile (streamed, double-buffered by BlockSpec)
    w_ref: (1, F)  f32 VMEM row, resident across all grid steps
    b_ref: (1, 1)  f32 scalar in SMEM
    o_ref: (TM, 1) f32 VMEM output tile
    """
    x = x_ref[...]                                   # (TM, F)
    w = w_ref[...]                                   # (1, F) -> broadcasts over rows
    prod = x * w                                     # VPU elementwise multiply
    r = jnp.sum(prod, axis=-1, keepdims=True)        # (TM, 1) XLU lane reduce, f32 acc
    o_ref[...] = (r + b_ref[0, 0]).astype(o_ref.dtype)


def linear_forward(x, w, b, *, tm_max=1024, x_tile_budget_bytes=4 * 1024 * 1024):
    """y = x @ w.T + b with w of shape (1, F) (PyTorch layout), b of shape (1, 1)."""
    B, F = x.shape
    assert w.shape == (1, F)
    assert b.shape == (1, 1)

    # Batch tile: multiple of 8 sublanes, capped so 2x (double buffer) x tile
    # stays comfortably inside v7x's smaller scoped VMEM; never bigger than the
    # (8-aligned) batch so tiny inputs don't over-pad.
    bytes_per_row = F * x.dtype.itemsize
    tm_fit = max(8, (x_tile_budget_bytes // bytes_per_row) // 8 * 8)
    tm = int(min(tm_max, tm_fit, _round_up(B, 8)))

    b_padded = _round_up(B, tm)
    num_tiles = b_padded // tm
    if b_padded != B:
        x = jnp.pad(x, ((0, b_padded - B), (0, 0)))

    out = pl.pallas_call(
        _linreg_kernel,
        out_shape=jax.ShapeDtypeStruct((b_padded, 1), jnp.float32),
        grid=(num_tiles,),
        in_specs=[
            pl.BlockSpec((tm, F), lambda i: (i, 0)),             # x: streamed batch tiles
            pl.BlockSpec((1, F), lambda i: (0, 0)),              # w: resident weight row
            pl.BlockSpec(memory_space=pltpu.MemorySpace.SMEM),   # b: scalar in SMEM
        ],
        out_specs=pl.BlockSpec((tm, 1), lambda i: (i, 0)),
        compiler_params=pltpu.CompilerParams(
            dimension_semantics=("parallel",),
            vmem_limit_bytes=32 * 1024 * 1024,
        ),
    )(x, w, b)

    return out[:B]


class MyModuleJax:
    """JAX/Pallas mirror of MyModule = Sequential(Linear(in_features, 1, bias=True))."""

    def __init__(self, in_features, key):
        kw, kb = jax.random.split(key)
        bound = 1.0 / float(in_features) ** 0.5
        # PyTorch nn.Linear default init U(-1/sqrt(fan_in), 1/sqrt(fan_in));
        # weight kept in PyTorch layout (out_features=1, in_features) == (1, F).
        self.w = jax.random.uniform(
            kw, (1, in_features), dtype=jnp.float32, minval=-bound, maxval=bound
        )
        self.b = jax.random.uniform(
            kb, (1, 1), dtype=jnp.float32, minval=-bound, maxval=bound
        )

    def __call__(self, x):
        return linear_forward(x, self.w, self.b)


if __name__ == "__main__":
    key = jax.random.PRNGKey(0)
    k_param, k_x, k_x2 = jax.random.split(key, 3)

    batch, in_features = 8, 32
    module = MyModuleJax(in_features, k_param)

    # Primary small test.
    x = jax.random.normal(k_x, (batch, in_features), dtype=jnp.float32)
    out = jax.block_until_ready(module(x))
    ref = x @ module.w.T + module.b
    assert out.shape == (batch, 1)
    assert jnp.allclose(out, ref, atol=1e-5, rtol=1e-5)

    # Exercise the batch-padding path (batch not a multiple of 8).
    x2 = jax.random.normal(k_x2, (13, in_features), dtype=jnp.float32)
    out2 = jax.block_until_ready(module(x2))
    ref2 = x2 @ module.w.T + module.b
    assert out2.shape == (13, 1)
    assert jnp.allclose(out2, ref2, atol=1e-5, rtol=1e-5)

    print("KERNEL_OK")
</pallas_src>

<mosaic_0001>
module attributes {stable_mosaic.version = 11 : i64} {
  func.func @_linreg_kernel(%arg0: i32, %arg1: memref<8x32xf32, #tpu.memory_space<vmem>>, %arg2: memref<1x32xf32, #tpu.memory_space<vmem>>, %arg3: memref<1x1xf32, #tpu.memory_space<smem>>, %arg4: memref<8x1xf32, #tpu.memory_space<vmem>>) attributes {dimension_semantics = [#tpu.dimension_semantics<parallel>], iteration_bounds = array<i64: 1>, scalar_prefetch = 0 : i64, scratch_operands = 0 : i64, tpu.core_type = #tpu.core_type<tc>, window_params = [{transform_indices = @transform_0, window_bounds = array<i64: 8, 32>}, {pipeline_mode = #tpu.pipeline_mode<synchronous>, transform_indices = @transform_1, window_bounds = array<i64: 1, 32>}, {transform_indices = @transform_2, window_bounds = array<i64: 1, 1>}, {transform_indices = @transform_3, window_bounds = array<i64: 8, 1>}]} {
    %c0 = arith.constant 0 : index
    %c0_0 = arith.constant 0 : index
    %0 = vector.load %arg1[%c0, %c0_0] : memref<8x32xf32, #tpu.memory_space<vmem>>, vector<8x32xf32>
    %c0_1 = arith.constant 0 : index
    %c0_2 = arith.constant 0 : index
    %1 = vector.load %arg2[%c0_1, %c0_2] : memref<1x32xf32, #tpu.memory_space<vmem>>, vector<1x32xf32>
    %2 = vector.broadcast %1 : vector<1x32xf32> to vector<8x32xf32>
    %3 = arith.mulf %0, %2 : vector<8x32xf32>
    %cst = arith.constant dense<0.000000e+00> : vector<8xf32>
    %4 = vector.multi_reduction <add>, %3, %cst [1] : vector<8x32xf32> to vector<8xf32>
    %5 = vector.shape_cast %4 : vector<8xf32> to vector<8x1xf32>
    %c0_3 = arith.constant 0 : index
    %c0_4 = arith.constant 0 : index
    %6 = memref.load %arg3[%c0_3, %c0_4] : memref<1x1xf32, #tpu.memory_space<smem>>
    %7 = vector.broadcast %6 : f32 to vector<8x1xf32>
    %8 = arith.addf %5, %7 : vector<8x1xf32>
    %c0_5 = arith.constant 0 : index
    %c0_6 = arith.constant 0 : index
    %9 = vector.load %arg4[%c0_5, %c0_6] : memref<8x1xf32, #tpu.memory_space<vmem>>, vector<8x1xf32>
    tpu.vector_store %arg4[%c0_5, %c0_6], %8 {strides = array<i32>} : memref<8x1xf32, #tpu.memory_space<vmem>>, vector<8x1xf32>,
    return
  }
  func.func @transform_0(%arg0: i32) -> (i32, i32) {
    %c0_i32 = arith.constant 0 : i32
    %c0_i32_0 = arith.constant 0 : i32
    return %arg0, %c0_i32 : i32, i32
  }
  func.func @transform_1(%arg0: i32) -> (i32, i32) {
    %c0_i32 = arith.constant 0 : i32
    %c0_i32_0 = arith.constant 0 : i32
    %c0_i32_1 = arith.constant 0 : i32
    return %c0_i32, %c0_i32_0 : i32, i32
  }
  func.func @transform_2(%arg0: i32) -> (i32, i32) {
    %c0_i32 = arith.constant 0 : i32
    %c0_i32_0 = arith.constant 0 : i32
    %c0_i32_1 = arith.constant 0 : i32
    return %c0_i32, %c0_i32_0 : i32, i32
  }
  func.func @transform_3(%arg0: i32) -> (i32, i32) {
    %c0_i32 = arith.constant 0 : i32
    %c0_i32_0 = arith.constant 0 : i32
    return %arg0, %c0_i32 : i32, i32
  }
}

</mosaic_0001>

<bundles_post_ra>
// kernel: tpu_custom_call.1
= control target key start
LH: loop header
LB: loop body
LE: loop exit
PB: predicated region body
PF: predicated region fallthrough
CT: control target
= control target key end

     0   :  { %9 = vsyncpa [#allocation4], 0  ;;  %s76_s12 = smov [#allocation3]   ;;  %s118_s0 = inlined_call_operand.hbm [shape: f32[8,32], index: 0, kind: input, shape index: {}]   ;;  %s119_s1 = inlined_call_operand.vmem [shape: f32[1,32], index: 1, kind: input, shape index: {}]   ;;  %s120_s2 = inlined_call_operand.<no memory space> [shape: f32[1,1], index: 2, kind: input, shape index: {}]   ;;  %s121_s3 = inlined_call_operand.vmem [shape: f32[8,1], index: 3, kind: output, shape index: {}]  }
   0x1   :  { %s16_s13 = sshll.u32 %s76_s12, 4  ;;  %s52_s16 = scalar_lea.hbm %s118_s0, 128  ;;  %s17_s13 = int_to_ptr.vmem [resolvable:$true] %s16_s13 }
   0x2   :  { %p53_p0 = scmp.ne.s32.totalorder %s118_s0, %s52_s16  ;;  %p56_p1 = scmp.lt.u32.totalorder %s52_s16, %s118_s0 }
   0x4   :  { %p58_p2 = pnand %p56_p1, %p53_p0 }
   0x6   :  { %61 = shalt.err (!%p58_p2)
}
   0x7   :  { %s62_s21 = scalar_lea.vmem %s17_s13, 128  ;;  %p67_p4 = scmp.lt.s32.totalorder %s17_s13, %s17_s13 }
   0x8   :  { %p63_p3 = scmp.ne.s32.totalorder %s17_s13, %s62_s21  ;;  %p68_p5 = scmp.lt.s32.totalorder %s62_s21, %s62_s21 }
   0xa   :  { %p69_p6 = por %p68_p5, %p67_p4 }
   0xc   :  { %p70_p7 = pnand %p69_p6, %p63_p3 }
   0xe   :  { %73 = shalt.err (!%p70_p7)
}
   0xf   :  { %19 = dma.hbm_to_vmem [thread:$0]  %s118_s0, 128, %s17_s13, [#allocation4]  }
  0x10   :  { %74 = dma.done.wait [#allocation4], 128  }
  0x11   :  { %75 = vsyncadd [#allocation4], 4294967168  ;;  %v27_v0 = vld [vmem:[#allocation3] sm:$0xff]  ;;  %vm36_vm0 = vcmask 261120   ;;  %v41_v4 = vstv %s120_s2  ;;  %vm43_vm1 = vcmask 7168  }
  0x12   :  { %v50_v1 = vld [vmem:[%s119_s1] ss:$0 sm:$0xff] }
  0x13   :  { %v35_v2 = vmul.f32 %v50_v1, %v27_v0 }
  0x15   :  { %v37_v3 = vsel %vm36_vm0, %v35_v2, 0.0 }
  0x16   :  { %38 = vadd.xlane.f32.xlu0 %v37_v3 }
  0xa3   :  { %v39_v5 = vpop.xlane.xlu0 %38 }
  0xa4   :  { %v42_v6 = vadd.f32 %v41_v4, %v39_v5 }
  0xa6   :  { %44 = vst.msk [vmem:[%s121_s3] sm:$0xff] %vm43_vm1, %v42_v6 }
  0xa7   :  { %49 = vsyncpa [#allocation4], 1 }

</bundles_post_ra>
